<compile_context>
chip_gen: v5e
topology: v5e:2x2
jax: 0.10.0
libtpu: 0.0.40
codegen_flags: <defaults>
</compile_context>

<pallas_src>
import jax
import jax.numpy as jnp
from jax.experimental import pallas as pl
from jax.experimental.pallas import tpu as pltpu

_LANE = 128


def _round_up(v, m):
    return ((v + m - 1) // m) * m


def _vmem_capacity_bytes():
    try:
        return int(pltpu.get_tpu_info().vmem_capacity_bytes)
    except Exception:
        return 64 * 1024 * 1024  # conservative: v7x per-TensorCore VMEM


# --------------------------------------------------------------------------- #
# Fused main path: B/BH resident in VMEM, lane-dense K tiles streamed.
# --------------------------------------------------------------------------- #
def agrid_kernel(b_ref, bh_ref, x_ref, y_ref, err_ref):
    """One lane-dense column tile: y = B @ x ; err = x - BH @ y."""
    y = jnp.dot(b_ref[...], x_ref[...], preferred_element_type=jnp.float32)
    y_ref[...] = y.astype(y_ref.dtype)
    recon = jnp.dot(bh_ref[...], y.astype(bh_ref.dtype),
                    preferred_element_type=jnp.float32)
    # Fresh x read after the second matmul: x is already in VMEM, this just
    # shortens the vreg live range across the two MXU ops.
    err_ref[...] = (x_ref[...].astype(jnp.float32) - recon).astype(err_ref.dtype)


# --------------------------------------------------------------------------- #
# Fallback path: standard tiled matmul (contraction axis last, accumulator
# scratch + pl.when init/finalize) for when B/BH don't fit resident in VMEM.
# --------------------------------------------------------------------------- #
def _mm_kernel(a_ref, x_ref, o_ref, acc_ref):
    @pl.when(pl.program_id(2) == 0)
    def _():
        acc_ref[...] = jnp.zeros_like(acc_ref)
    acc_ref[...] += jnp.dot(a_ref[...], x_ref[...],
                            preferred_element_type=jnp.float32)

    @pl.when(pl.program_id(2) == pl.num_programs(2) - 1)
    def _():
        o_ref[...] = acc_ref[...].astype(o_ref.dtype)


def _mm_sub_kernel(a_ref, x_ref, s_ref, o_ref, acc_ref):
    @pl.when(pl.program_id(2) == 0)
    def _():
        acc_ref[...] = jnp.zeros_like(acc_ref)
    acc_ref[...] += jnp.dot(a_ref[...], x_ref[...],
                            preferred_element_type=jnp.float32)

    @pl.when(pl.program_id(2) == pl.num_programs(2) - 1)
    def _():
        o_ref[...] = (s_ref[...].astype(jnp.float32) - acc_ref[...]).astype(o_ref.dtype)


def _tiled_matmul(A, X, sub=None, *, out_dtype):
    """out = A @ X  (or sub - A @ X if sub is given), tiled over all 3 dims."""
    Mo, C = A.shape
    C2, K = X.shape
    assert C2 == C

    tm = Mo if Mo <= 256 else 256
    tk = min(512, _round_up(K, _LANE))
    tc = min(512, _round_up(C, _LANE))
    # Zero-pad the contraction dim so no partial (garbage-filled) reduction
    # block ever feeds the accumulator. Zeros are mathematically exact.
    Cp = _round_up(C, tc)
    if Cp != C:
        A = jnp.pad(A, ((0, 0), (0, Cp - C)))
        X = jnp.pad(X, ((0, Cp - C), (0, 0)))

    grid = (pl.cdiv(Mo, tm), pl.cdiv(K, tk), Cp // tc)

    in_specs = [
        pl.BlockSpec((tm, tc), lambda i, j, c: (i, c)),
        pl.BlockSpec((tc, tk), lambda i, j, c: (c, j)),
    ]
    args = [A, X]
    if sub is None:
        kernel = _mm_kernel
    else:
        kernel = _mm_sub_kernel
        in_specs.append(pl.BlockSpec((tm, tk), lambda i, j, c: (i, j)))
        args.append(sub)

    return pl.pallas_call(
        kernel,
        out_shape=jax.ShapeDtypeStruct((Mo, K), out_dtype),
        grid=grid,
        in_specs=in_specs,
        out_specs=pl.BlockSpec((tm, tk), lambda i, j, c: (i, j)),
        scratch_shapes=[pltpu.VMEM((tm, tk), jnp.float32)],
        compiler_params=pltpu.CompilerParams(
            dimension_semantics=("parallel", "parallel", "arbitrary"),
            vmem_limit_bytes=32 * 1024 * 1024,
        ),
    )(*args)


def _agrid_fallback(B, BH, x, out_dtype):
    # TODO(synk): a fully fused large-M/N kernel (y tile resident per K tile)
    # would avoid the extra HBM round trip for y; two tiled calls keep this
    # path simple and correct.
    y = _tiled_matmul(B, x, out_dtype=out_dtype)
    err = _tiled_matmul(BH, y.astype(BH.dtype), sub=x, out_dtype=out_dtype)
    return y, err


# --------------------------------------------------------------------------- #
# Wrapper
# --------------------------------------------------------------------------- #
def agrid_forward(B, BH, x, *, block_k=2048, compute_dtype=None,
                  vmem_budget_bytes=None):
    """Fused Agrid forward. Returns (y, err) with y=(M,K), err=(N,K)."""
    M, N = B.shape
    N2, M2 = BH.shape
    assert (N2, M2) == (N, M), "BH must be (N, M)"
    Nx, K = x.shape
    assert Nx == N, "x must be (N, K)"

    out_dtype = x.dtype
    if compute_dtype is not None:
        # Fast path: bf16 MXU inputs with f32 accumulation (expect ~1e-2 rel.
        # deviation vs the f32 reference; y is re-cast before the 2nd matmul).
        B = B.astype(compute_dtype)
        BH = BH.astype(compute_dtype)
        x = x.astype(compute_dtype)

    w_itemsize = jnp.dtype(B.dtype).itemsize
    x_itemsize = jnp.dtype(x.dtype).itemsize
    o_itemsize = jnp.dtype(out_dtype).itemsize

    capacity = _vmem_capacity_bytes()
    if vmem_budget_bytes is None:
        vmem_budget_bytes = int(0.75 * capacity)

    # Resident weights are single-buffered (constant index_map + Buffered(1)).
    weights_bytes = (M * N + N * M) * w_itemsize

    def tiles_bytes(tk_):
        # Streamed x/y/err tiles, double-buffered by the pipeline; y/err are
        # out_dtype regardless of the compute dtype.
        return 2 * (N * tk_ * x_itemsize + (M + N) * tk_ * o_itemsize)

    # If even the narrowest lane-dense tile does not fit with B/BH resident
    # (large M, N — especially on v7x's 64 MiB VMEM), take the tiled fallback.
    if weights_bytes + tiles_bytes(_LANE) > vmem_budget_bytes:
        return _agrid_fallback(B, BH, x, out_dtype)

    # Widest lane-dense K tile that fits the budget.
    tk = min(_round_up(block_k, _LANE), _round_up(K, _LANE))
    while tk > _LANE and weights_bytes + tiles_bytes(tk) > vmem_budget_bytes:
        tk -= _LANE

    # Keep >= 2 grid steps when K allows it, so both v7x TensorCores (and the
    # DMA pipeline) have work.
    if pl.cdiv(K, tk) < 2 and K > 2 * _LANE:
        tk = max(2 * _LANE, _round_up(pl.cdiv(K, 2), _LANE))

    grid = (pl.cdiv(K, tk),)
    vmem_limit = max(weights_bytes + tiles_bytes(tk) + (4 << 20), 32 << 20)
    vmem_limit = int(min(vmem_limit, capacity))

    cost = pl.CostEstimate(
        flops=4 * M * N * K,                               # two matmuls
        transcendentals=0,
        bytes_accessed=(M * N + N * M) * w_itemsize
        + N * K * x_itemsize
        + (M + N) * K * o_itemsize,
    )

    out_shape = (
        jax.ShapeDtypeStruct((M, K), out_dtype),
        jax.ShapeDtypeStruct((N, K), out_dtype),
    )

    def build(single_buffer_weights):
        if single_buffer_weights:
            b_spec = pl.BlockSpec((M, N), lambda k: (0, 0),
                                  pipeline_mode=pl.Buffered(1))
            bh_spec = pl.BlockSpec((N, M), lambda k: (0, 0),
                                   pipeline_mode=pl.Buffered(1))
        else:
            b_spec = pl.BlockSpec((M, N), lambda k: (0, 0))
            bh_spec = pl.BlockSpec((N, M), lambda k: (0, 0))
        return pl.pallas_call(
            agrid_kernel,
            out_shape=out_shape,
            grid_spec=pl.GridSpec(
                grid=grid,
                in_specs=[
                    b_spec,                                   # B: resident
                    bh_spec,                                  # BH: resident
                    pl.BlockSpec((N, tk), lambda k: (0, k)),  # x: streamed
                ],
                out_specs=(
                    pl.BlockSpec((M, tk), lambda k: (0, k)),  # y
                    pl.BlockSpec((N, tk), lambda k: (0, k)),  # err
                ),
            ),
            compiler_params=pltpu.CompilerParams(
                dimension_semantics=("parallel",),  # no cross-tile carry
                vmem_limit_bytes=vmem_limit,
            ),
            cost_estimate=cost,
        )

    try:
        return build(True)(B, BH, x)
    except Exception:
        # This jax build rejected pipeline_mode=pl.Buffered(1); use defaults.
        return build(False)(B, BH, x)


if __name__ == "__main__":
    key = jax.random.PRNGKey(0)
    kb, kbh, kx = jax.random.split(key, 3)

    # Small shapes consistent with the module's forward: B:(M,N), BH:(N,M), x:(N,K)
    M, N, K = 16, 32, 8
    B = jax.random.normal(kb, (M, N), dtype=jnp.float32) / jnp.sqrt(N)
    BH = jax.random.normal(kbh, (N, M), dtype=jnp.float32) / jnp.sqrt(M)
    x = jax.random.normal(kx, (N, K), dtype=jnp.float32)

    y, err = agrid_forward(B, BH, x)
    jax.block_until_ready((y, err))
    y_ref = B @ x
    err_ref = x - BH @ y_ref
    assert jnp.allclose(y, y_ref, atol=1e-5, rtol=1e-5)
    assert jnp.allclose(err, err_ref, atol=1e-5, rtol=1e-5)

    # Multi-tile grid (tiny-grid guard -> 2 tiles) with a masked partial
    # boundary block; no host-side padding or output slicing.
    K2 = 300
    x2 = jax.random.normal(jax.random.PRNGKey(1), (N, K2), dtype=jnp.float32)
    y2, err2 = agrid_forward(B, BH, x2)
    jax.block_until_ready((y2, err2))
    y2_ref = B @ x2
    err2_ref = x2 - BH @ y2_ref
    assert jnp.allclose(y2, y2_ref, atol=1e-5, rtol=1e-5)
    assert jnp.allclose(err2, err2_ref, atol=1e-5, rtol=1e-5)

    # Exercise the non-resident (tiled, contraction-padded) fallback path by
    # forcing a tiny VMEM budget.
    y3, err3 = agrid_forward(B, BH, x2, vmem_budget_bytes=16 * 1024)
    jax.block_until_ready((y3, err3))
    assert jnp.allclose(y3, y2_ref, atol=1e-5, rtol=1e-5)
    assert jnp.allclose(err3, err2_ref, atol=1e-5, rtol=1e-5)

    print("KERNEL_OK")
</pallas_src>

<mosaic_0001>
module attributes {stable_mosaic.version = 11 : i64} {
  func.func @agrid_kernel(%arg0: i32, %arg1: memref<16x32xf32, #tpu.memory_space<vmem>>, %arg2: memref<32x16xf32, #tpu.memory_space<vmem>>, %arg3: memref<32x128xf32, #tpu.memory_space<vmem>>, %arg4: memref<16x128xf32, #tpu.memory_space<vmem>>, %arg5: memref<32x128xf32, #tpu.memory_space<vmem>>) attributes {dimension_semantics = [#tpu.dimension_semantics<parallel>], iteration_bounds = array<i64: 1>, scalar_prefetch = 0 : i64, scratch_operands = 0 : i64, tpu.core_type = #tpu.core_type<tc>, window_params = [{pipeline_mode = #tpu.pipeline_mode<synchronous>, transform_indices = @transform_0, window_bounds = array<i64: 16, 32>}, {pipeline_mode = #tpu.pipeline_mode<synchronous>, transform_indices = @transform_1, window_bounds = array<i64: 32, 16>}, {transform_indices = @transform_2, window_bounds = array<i64: 32, 128>}, {transform_indices = @transform_3, window_bounds = array<i64: 16, 128>}, {transform_indices = @transform_4, window_bounds = array<i64: 32, 128>}]} {
    %c0 = arith.constant 0 : index
    %c0_0 = arith.constant 0 : index
    %0 = vector.load %arg1[%c0, %c0_0] : memref<16x32xf32, #tpu.memory_space<vmem>>, vector<16x32xf32>
    %c0_1 = arith.constant 0 : index
    %c0_2 = arith.constant 0 : index
    %1 = vector.load %arg3[%c0_1, %c0_2] : memref<32x128xf32, #tpu.memory_space<vmem>>, vector<32x128xf32>
    %cst = arith.constant dense<0.000000e+00> : vector<16x128xf32>
    %2 = tpu.matmul %0, %1, %cst {dimension_numbers = #tpu.dot_dimension_numbers<[1], [0], [0], [1], [0, 0, 1, 1], [], []>} : vector<16x32xf32>, vector<32x128xf32>, vector<16x128xf32> -> vector<16x128xf32>
    %c0_3 = arith.constant 0 : index
    %c0_4 = arith.constant 0 : index
    %3 = vector.load %arg4[%c0_3, %c0_4] : memref<16x128xf32, #tpu.memory_space<vmem>>, vector<16x128xf32>
    tpu.vector_store %arg4[%c0_3, %c0_4], %2 {strides = array<i32>} : memref<16x128xf32, #tpu.memory_space<vmem>>, vector<16x128xf32>,
    %c0_5 = arith.constant 0 : index
    %c0_6 = arith.constant 0 : index
    %4 = vector.load %arg2[%c0_5, %c0_6] : memref<32x16xf32, #tpu.memory_space<vmem>>, vector<32x16xf32>
    %cst_7 = arith.constant dense<0.000000e+00> : vector<32x128xf32>
    %5 = tpu.matmul %4, %2, %cst_7 {dimension_numbers = #tpu.dot_dimension_numbers<[1], [0], [0], [1], [0, 0, 1, 1], [], []>} : vector<32x16xf32>, vector<16x128xf32>, vector<32x128xf32> -> vector<32x128xf32>
    %c0_8 = arith.constant 0 : index
    %c0_9 = arith.constant 0 : index
    %6 = vector.load %arg3[%c0_8, %c0_9] : memref<32x128xf32, #tpu.memory_space<vmem>>, vector<32x128xf32>
    %7 = arith.subf %6, %5 : vector<32x128xf32>
    %c0_10 = arith.constant 0 : index
    %c0_11 = arith.constant 0 : index
    %8 = vector.load %arg5[%c0_10, %c0_11] : memref<32x128xf32, #tpu.memory_space<vmem>>, vector<32x128xf32>
    tpu.vector_store %arg5[%c0_10, %c0_11], %7 {strides = array<i32>} : memref<32x128xf32, #tpu.memory_space<vmem>>, vector<32x128xf32>,
    return
  }
  func.func @transform_0(%arg0: i32) -> (i32, i32) {
    %c0_i32 = arith.constant 0 : i32
    %c0_i32_0 = arith.constant 0 : i32
    %c0_i32_1 = arith.constant 0 : i32
    return %c0_i32, %c0_i32_0 : i32, i32
  }
  func.func @transform_1(%arg0: i32) -> (i32, i32) {
    %c0_i32 = arith.constant 0 : i32
    %c0_i32_0 = arith.constant 0 : i32
    %c0_i32_1 = arith.constant 0 : i32
    return %c0_i32, %c0_i32_0 : i32, i32
  }
  func.func @transform_2(%arg0: i32) -> (i32, i32) {
    %c0_i32 = arith.constant 0 : i32
    %c0_i32_0 = arith.constant 0 : i32
    return %c0_i32, %arg0 : i32, i32
  }
  func.func @transform_3(%arg0: i32) -> (i32, i32) {
    %c0_i32 = arith.constant 0 : i32
    %c0_i32_0 = arith.constant 0 : i32
    return %c0_i32, %arg0 : i32, i32
  }
  func.func @transform_4(%arg0: i32) -> (i32, i32) {
    %c0_i32 = arith.constant 0 : i32
    %c0_i32_0 = arith.constant 0 : i32
    return %c0_i32, %arg0 : i32, i32
  }
}

module attributes {stable_mosaic.version = 11 : i64} {
  func.func @agrid_kernel(%arg0: i32, %arg1: memref<16x32xf32, #tpu.memory_space<vmem>>, %arg2: memref<32x16xf32, #tpu.memory_space<vmem>>, %arg3: memref<32x128xf32, #tpu.memory_space<vmem>>, %arg4: memref<16x128xf32, #tpu.memory_space<vmem>>, %arg5: memref<32x128xf32, #tpu.memory_space<vmem>>) attributes {dimension_semantics = [#tpu.dimension_semantics<parallel>], iteration_bounds = array<i64: 1>, scalar_prefetch = 0 : i64, scratch_operands = 0 : i64, tpu.core_type = #tpu.core_type<tc>, window_params = [{pipeline_mode = #tpu.pipeline_mode<synchronous>, transform_indices = @transform_0, window_bounds = array<i64: 16, 32>}, {pipeline_mode = #tpu.pipeline_mode<synchronous>, transform_indices = @transform_1, window_bounds = array<i64: 32, 16>}, {transform_indices = @transform_2, window_bounds = array<i64: 32, 128>}, {transform_indices = @transform_3, window_bounds = array<i64: 16, 128>}, {transform_indices = @transform_4, window_bounds = array<i64: 32, 128>}]} {
    %c0 = arith.constant 0 : index
    %c0_0 = arith.constant 0 : index
    %0 = vector.load %arg1[%c0, %c0_0] : memref<16x32xf32, #tpu.memory_space<vmem>>, vector<16x32xf32>
    %c0_1 = arith.constant 0 : index
    %c0_2 = arith.constant 0 : index
    %1 = vector.load %arg3[%c0_1, %c0_2] : memref<32x128xf32, #tpu.memory_space<vmem>>, vector<32x128xf32>
    %cst = arith.constant dense<0.000000e+00> : vector<16x128xf32>
    %2 = tpu.matmul %0, %1, %cst {dimension_numbers = #tpu.dot_dimension_numbers<[1], [0], [0], [1], [0, 0, 1, 1], [], []>} : vector<16x32xf32>, vector<32x128xf32>, vector<16x128xf32> -> vector<16x128xf32>
    %c0_3 = arith.constant 0 : index
    %c0_4 = arith.constant 0 : index
    %3 = vector.load %arg4[%c0_3, %c0_4] : memref<16x128xf32, #tpu.memory_space<vmem>>, vector<16x128xf32>
    tpu.vector_store %arg4[%c0_3, %c0_4], %2 {strides = array<i32>} : memref<16x128xf32, #tpu.memory_space<vmem>>, vector<16x128xf32>,
    %c0_5 = arith.constant 0 : index
    %c0_6 = arith.constant 0 : index
    %4 = vector.load %arg2[%c0_5, %c0_6] : memref<32x16xf32, #tpu.memory_space<vmem>>, vector<32x16xf32>
    %cst_7 = arith.constant dense<0.000000e+00> : vector<32x128xf32>
    %5 = tpu.matmul %4, %2, %cst_7 {dimension_numbers = #tpu.dot_dimension_numbers<[1], [0], [0], [1], [0, 0, 1, 1], [], []>} : vector<32x16xf32>, vector<16x128xf32>, vector<32x128xf32> -> vector<32x128xf32>
    %c0_8 = arith.constant 0 : index
    %c0_9 = arith.constant 0 : index
    %6 = vector.load %arg3[%c0_8, %c0_9] : memref<32x128xf32, #tpu.memory_space<vmem>>, vector<32x128xf32>
    %7 = arith.subf %6, %5 : vector<32x128xf32>
    %c0_10 = arith.constant 0 : index
    %c0_11 = arith.constant 0 : index
    %8 = vector.load %arg5[%c0_10, %c0_11] : memref<32x128xf32, #tpu.memory_space<vmem>>, vector<32x128xf32>
    tpu.vector_store %arg5[%c0_10, %c0_11], %7 {strides = array<i32>} : memref<32x128xf32, #tpu.memory_space<vmem>>, vector<32x128xf32>,
    return
  }
  func.func @transform_0(%arg0: i32) -> (i32, i32) {
    %c0_i32 = arith.constant 0 : i32
    %c0_i32_0 = arith.constant 0 : i32
    %c0_i32_1 = arith.constant 0 : i32
    return %c0_i32, %c0_i32_0 : i32, i32
  }
  func.func @transform_1(%arg0: i32) -> (i32, i32) {
    %c0_i32 = arith.constant 0 : i32
    %c0_i32_0 = arith.constant 0 : i32
    %c0_i32_1 = arith.constant 0 : i32
    return %c0_i32, %c0_i32_0 : i32, i32
  }
  func.func @transform_2(%arg0: i32) -> (i32, i32) {
    %c0_i32 = arith.constant 0 : i32
    %c0_i32_0 = arith.constant 0 : i32
    return %c0_i32, %arg0 : i32, i32
  }
  func.func @transform_3(%arg0: i32) -> (i32, i32) {
    %c0_i32 = arith.constant 0 : i32
    %c0_i32_0 = arith.constant 0 : i32
    return %c0_i32, %arg0 : i32, i32
  }
  func.func @transform_4(%arg0: i32) -> (i32, i32) {
    %c0_i32 = arith.constant 0 : i32
    %c0_i32_0 = arith.constant 0 : i32
    return %c0_i32, %arg0 : i32, i32
  }
}

</mosaic_0001>

<bundles_post_ra>
// kernel: tpu_custom_call.1
= control target key start
LH: loop header
LB: loop body
LE: loop exit
PB: predicated region body
PF: predicated region fallthrough
CT: control target
= control target key end

     0   :  { %vm22_vm0 = vcmask 261120   ;;  %vm58_vm1 = vcmask 130048   ;;  %s205_s2 = inlined_call_operand.vmem [shape: f32[32,8], index: 2, kind: input, shape index: {}]   ;;  %s206_s0 = inlined_call_operand.vmem [shape: f32[16,32], index: 0, kind: input, shape index: {}]   ;;  %s207_s3 = inlined_call_operand.vmem [shape: f32[16,8], index: 3, kind: output, shape index: {0}]   ;;  %s208_s1 = inlined_call_operand.vmem [shape: f32[32,16], index: 1, kind: input, shape index: {}]   ;;  %s209_s4 = inlined_call_operand.vmem [shape: f32[32,8], index: 4, kind: output, shape index: {1}]  }
   0x1   :  { %v21_v0 = vld [vmem:[%s205_s2 + $0x18] sm:$0xff]  ;;  %v20_v1 = vld [vmem:[%s205_s2 + $0x10] sm:$0xff]  ;;  %v19_v2 = vld [vmem:[%s205_s2 + $0x8] sm:$0xff] }
   0x2   :  { %126 = vmatpush.msra.mxu3 %v21_v0  ;;  %41 = vmatpush.msra.mxu0 %v21_v0  ;;  %v18_v3 = vld [vmem:[%s205_s2] sm:$0xff]  ;;  %v17_v4 = vld [vmem:[%s206_s0 + $0x8] sm:$0xff]  ;;  %v56_v8 = vld [vmem:[%s208_s1 + $0x10] sm:$0xff] }
   0x3   :  { %v16_v5 = vld [vmem:[%s206_s0] sm:$0xff]  ;;  %v57_v10 = vld [vmem:[%s208_s1 + $0x18] sm:$0xff]  ;;  %v55_v11 = vld [vmem:[%s208_s1 + $0x8] sm:$0xff] }
   0x4   :  { %127 = vmatpush.msra.mxu3 %v20_v1  ;;  %42 = vmatpush.msra.mxu0 %v20_v1  ;;  %v54_v9 = vld [vmem:[%s208_s1] sm:$0xff] }
   0x6   :  { %128 = vmatpush.msra.mxu3 %v19_v2  ;;  %43 = vmatpush.msra.mxu0 %v19_v2 }
   0x8   :  { %129 = vmatpush.msra.mxu3 %v18_v3  ;;  %44 = vmatpush.msra.mxu0 %v18_v3 }
   0x9   :  { %121 = vmatmul.msk.f32.vlgmr.msra.gmra.mxu3 %vm22_vm0, %v17_v4  ;;  %120 = vmatmul.msk.f32.vlgmr.msra.gmra.mxu0 %vm22_vm0, %v16_v5 }
  0x86   :  { %v46_v6 = vpop.f32.mrf.mxu0 }
  0x87   :  { %52 = vst [vmem:[%s207_s3] sm:$0xff] %v46_v6 }
  0x8c   :  { %v49_v7 = vpop.f32.mrf.mxu3 }
  0x8d   :  { %53 = vst [vmem:[%s207_s3 + $0x8] sm:$0xff] %v49_v7  ;;  %85 = vmatpush.msra.mxu1 %v49_v7  ;;  %130 = vmatpush.msra.mxu2 %v49_v7 }
  0x8f   :  { %86 = vmatpush.msra.mxu1 %v46_v6  ;;  %131 = vmatpush.msra.mxu2 %v46_v6 }
  0x90   :  { %124 = vmatmul.msk.f32.vlgmr.msra.gmra.mxu2 %vm58_vm1, %v56_v8  ;;  %122 = vmatmul.msk.f32.vlgmr.msra.gmra.mxu1 %vm58_vm1, %v54_v9 }
  0x98   :  { %125 = vmatmul.msk.f32.gmra.mxu2 %vm58_vm1, %v57_v10  ;;  %123 = vmatmul.msk.f32.gmra.mxu1 %vm58_vm1, %v55_v11 }
 0x10d   :  { %v88_v12 = vpop.f32.mrf.mxu1 }
 0x10e   :  { %v104_v13 = vsub.f32 %v18_v3, %v88_v12 }
 0x110   :  { %108 = vst [vmem:[%s209_s4] sm:$0xff] %v104_v13 }
 0x113   :  { %v94_v14 = vpop.f32.mrf.mxu2 }
 0x114   :  { %v106_v15 = vsub.f32 %v20_v1, %v94_v14 }
 0x115   :  { %v91_v16 = vpop.f32.mrf.mxu1 }
 0x116   :  { %110 = vst [vmem:[%s209_s4 + $0x10] sm:$0xff] %v106_v15  ;;  %v105_v17 = vsub.f32 %v19_v2, %v91_v16 }
 0x118   :  { %109 = vst [vmem:[%s209_s4 + $0x8] sm:$0xff] %v105_v17 }
 0x11b   :  { %v97_v18 = vpop.f32.mrf.mxu2 }
 0x11c   :  { %v107_v19 = vsub.f32 %v21_v0, %v97_v18 }
 0x11e   :  { %111 = vst [vmem:[%s209_s4 + $0x18] sm:$0xff] %v107_v19 }

// kernel: tpu_custom_call.1
= control target key start
LH: loop header
LB: loop body
LE: loop exit
PB: predicated region body
PF: predicated region fallthrough
CT: control target
= control target key end

     0   :  { %vm22_vm0 = vcmask 261120   ;;  %vm58_vm1 = vcmask 130048   ;;  %s205_s2 = inlined_call_operand.vmem [shape: f32[32,8], index: 2, kind: input, shape index: {}]   ;;  %s206_s0 = inlined_call_operand.vmem [shape: f32[16,32], index: 0, kind: input, shape index: {}]   ;;  %s207_s3 = inlined_call_operand.vmem [shape: f32[16,8], index: 3, kind: output, shape index: {0}]   ;;  %s208_s1 = inlined_call_operand.vmem [shape: f32[32,16], index: 1, kind: input, shape index: {}]   ;;  %s209_s4 = inlined_call_operand.vmem [shape: f32[32,8], index: 4, kind: output, shape index: {1}]  }
   0x1   :  { %v21_v0 = vld [vmem:[%s205_s2 + $0x18] sm:$0xff]  ;;  %v20_v1 = vld [vmem:[%s205_s2 + $0x10] sm:$0xff]  ;;  %v19_v2 = vld [vmem:[%s205_s2 + $0x8] sm:$0xff] }
   0x2   :  { %126 = vmatpush.msra.mxu3 %v21_v0  ;;  %41 = vmatpush.msra.mxu0 %v21_v0  ;;  %v18_v3 = vld [vmem:[%s205_s2] sm:$0xff]  ;;  %v17_v4 = vld [vmem:[%s206_s0 + $0x8] sm:$0xff]  ;;  %v56_v8 = vld [vmem:[%s208_s1 + $0x10] sm:$0xff] }
   0x3   :  { %v16_v5 = vld [vmem:[%s206_s0] sm:$0xff]  ;;  %v57_v10 = vld [vmem:[%s208_s1 + $0x18] sm:$0xff]  ;;  %v55_v11 = vld [vmem:[%s208_s1 + $0x8] sm:$0xff] }
   0x4   :  { %127 = vmatpush.msra.mxu3 %v20_v1  ;;  %42 = vmatpush.msra.mxu0 %v20_v1  ;;  %v54_v9 = vld [vmem:[%s208_s1] sm:$0xff] }
   0x6   :  { %128 = vmatpush.msra.mxu3 %v19_v2  ;;  %43 = vmatpush.msra.mxu0 %v19_v2 }
   0x8   :  { %129 = vmatpush.msra.mxu3 %v18_v3  ;;  %44 = vmatpush.msra.mxu0 %v18_v3 }
   0x9   :  { %121 = vmatmul.msk.f32.vlgmr.msra.gmra.mxu3 %vm22_vm0, %v17_v4  ;;  %120 = vmatmul.msk.f32.vlgmr.msra.gmra.mxu0 %vm22_vm0, %v16_v5 }
  0x86   :  { %v46_v6 = vpop.f32.mrf.mxu0 }
  0x87   :  { %52 = vst [vmem:[%s207_s3] sm:$0xff] %v46_v6 }
  0x8c   :  { %v49_v7 = vpop.f32.mrf.mxu3 }
  0x8d   :  { %53 = vst [vmem:[%s207_s3 + $0x8] sm:$0xff] %v49_v7  ;;  %85 = vmatpush.msra.mxu1 %v49_v7  ;;  %130 = vmatpush.msra.mxu2 %v49_v7 }
  0x8f   :  { %86 = vmatpush.msra.mxu1 %v46_v6  ;;  %131 = vmatpush.msra.mxu2 %v46_v6 }
  0x90   :  { %124 = vmatmul.msk.f32.vlgmr.msra.gmra.mxu2 %vm58_vm1, %v56_v8  ;;  %122 = vmatmul.msk.f32.vlgmr.msra.gmra.mxu1 %vm58_vm1, %v54_v9 }
  0x98   :  { %125 = vmatmul.msk.f32.gmra.mxu2 %vm58_vm1, %v57_v10  ;;  %123 = vmatmul.msk.f32.gmra.mxu1 %vm58_vm1, %v55_v11 }
 0x10d   :  { %v88_v12 = vpop.f32.mrf.mxu1 }
 0x10e   :  { %v104_v13 = vsub.f32 %v18_v3, %v88_v12 }
 0x110   :  { %108 = vst [vmem:[%s209_s4] sm:$0xff] %v104_v13 }
 0x113   :  { %v94_v14 = vpop.f32.mrf.mxu2 }
 0x114   :  { %v106_v15 = vsub.f32 %v20_v1, %v94_v14 }
 0x115   :  { %v91_v16 = vpop.f32.mrf.mxu1 }
 0x116   :  { %110 = vst [vmem:[%s209_s4 + $0x10] sm:$0xff] %v106_v15  ;;  %v105_v17 = vsub.f32 %v19_v2, %v91_v16 }
 0x118   :  { %109 = vst [vmem:[%s209_s4 + $0x8] sm:$0xff] %v105_v17 }
 0x11b   :  { %v97_v18 = vpop.f32.mrf.mxu2 }
 0x11c   :  { %v107_v19 = vsub.f32 %v21_v0, %v97_v18 }
 0x11e   :  { %111 = vst [vmem:[%s209_s4 + $0x18] sm:$0xff] %v107_v19 }

</bundles_post_ra>
